<compile_context>
chip_gen: v7x
topology: tpu7x:2x2x1
jax: 0.10.0
libtpu: 0.0.40
codegen_flags: <defaults>
</compile_context>

<pallas_src>
import numpy as np
import jax
import jax.numpy as jnp
from jax.experimental import pallas as pl
from jax.experimental.pallas import tpu as pltpu


def _round_up(x, m):
    return (x + m - 1) // m * m


def make_cnn2_kernel(b_tile, seq_len, vocab_pad, max_fs, n_pad):
    BTS = b_tile * seq_len

    def kernel(ids_ref, emb_ref, w_ref, mb_ref, wfc_ref, bfc_ref, out_ref):
        # ids_ref: [BTS, max_fs] int32  column s holds the token id at time t+s
        # emb_ref: [vocab_pad, E] bf16  VMEM-resident embedding table
        # w_ref  : [max_fs, E, n_pad] bf16  per-shift conv weight slab; columns
        #          sit at each filter's output block, zero where s >= filter_sz
        # mb_ref : [seq_len, n_pad] f32  conv bias on valid (t, col), -1e30 else
        # wfc_ref: [n_pad, out_pad] bf16, bfc_ref: [1, out_pad] f32
        # out_ref: [b_tile, out_pad] f32  lane-dense output slab

        # Hoisted once, reused by every shift's one-hot build.
        iota_v = jax.lax.broadcasted_iota(jnp.int32, (BTS, vocab_pad), 1)
        table = emb_ref[...]                                   # [Vp, E] bf16

        acc = None
        for s in range(max_fs):
            # Fused embedding gather: one-hot(ids at shift s) @ table on the
            # MXU — no HBM round trip of embedded activations.  The one-hot is
            # exact, so x_s == bf16 embedding rows exactly.
            ids_col = ids_ref[:, s:s + 1]                      # [BTS, 1] int32
            oh = jnp.where(iota_v == ids_col, 1.0, 0.0).astype(jnp.bfloat16)
            x_s = jnp.dot(oh, table,
                          preferred_element_type=jnp.float32).astype(jnp.bfloat16)
            # Shift realignment lives in the ids + the per-shift weight slab:
            # pure MXU columns, accumulated in f32 (no output-side rolls).
            d = jnp.dot(x_s, w_ref[s], preferred_element_type=jnp.float32)
            acc = d if acc is None else acc + d

        # Bias + time-validity folded into one additive constant.  ReLU >= 0
        # guarantees masked (-1e30 -> 0) rows never win the max-pool; if the
        # activation ever changes, this invariant must be revisited.
        act = jnp.maximum(acc.reshape(b_tile, seq_len, n_pad) + mb_ref[...], 0.0)
        pooled = jnp.max(act, axis=1)                          # [b_tile, n_pad]

        # TODO(synk): nn.Dropout is an inference-mode identity here (no RNG mask).
        logits = jnp.dot(pooled.astype(jnp.bfloat16), wfc_ref[...],
                         preferred_element_type=jnp.float32) + bfc_ref[...]
        out_ref[...] = jax.nn.sigmoid(logits)

    return kernel


def cnn2_forward(x_tokens, params, *, filter_sizes, batch_tile=256,
                 max_onehot_vocab=512):
    """x_tokens: [seq_len, batch] int32 token ids -> [batch, out_dim] float32.

    batch_tile: batch rows per grid step (rounded up to a multiple of 8).
    Default 256 keeps the in-kernel working set (one-hot + acc + act, the real
    VMEM cap — not the BlockSpec blocks) at a few MiB; sweep 256-1024 on
    v5e/v6e (128 MiB VMEM).  On v7x (64 MiB physical) keep the same sizing but
    pick batch_tile so padded_batch // batch_tile is >= 2 and even, so the
    "parallel" grid axis shards across both TensorCores.
    """
    filter_sizes = tuple(filter_sizes)
    emb_table = params["embedding"]                        # [vocab, E] f32
    seq_len, batch = x_tokens.shape
    vocab, emb_dim = emb_table.shape
    F = params["conv_w"][0].shape[-1]
    nfs = len(filter_sizes)
    max_fs = max(filter_sizes)
    output_dim = params["fc_w"].shape[-1]
    assert max_fs <= seq_len, "filter size larger than sequence length"

    vocab_pad = _round_up(vocab, 128)
    if vocab_pad > max_onehot_vocab:
        # TODO(synk): large-vocab path — keep the table in HBM (pl.ANY) and
        # DMA-gather the needed rows (or scalar-prefetch ids + pl.Element row
        # gather) instead of the one-hot MXU gather used for small vocabs.
        raise NotImplementedError("in-kernel one-hot gather only for small vocab")

    # ---- batch tiling ------------------------------------------------------
    if batch <= batch_tile:
        b_tile = _round_up(batch, 8)
        padded_batch = b_tile                               # single grid step
    else:
        b_tile = _round_up(batch_tile, 8)
        padded_batch = _round_up(batch, b_tile)
    BTS = b_tile * seq_len

    # ---- lane-dense packed operands (wrapper-side, once) -------------------
    tot_cols = nfs * F
    # NOTE: round to 256 on v6e/v7x when tot_cols lands between 128 and 256 —
    # their MXU is 256-wide in N (v5e's 128x128 MXU is fine with 128).
    n_pad = _round_up(tot_cols, 128)
    out_pad = _round_up(output_dim, 128)

    # Embedding table, zero-padded to vocab_pad rows, bf16.
    table = jnp.pad(emb_table, ((0, vocab_pad - vocab), (0, 0))).astype(jnp.bfloat16)

    # Per-shift conv weight slabs: shift s slab has filter i's tap s at columns
    # [i*F, (i+1)*F), zero where s >= filter_size (validity baked into weights).
    w_all = np.zeros((max_fs, emb_dim, n_pad), np.float32)
    for i, (fs, w) in enumerate(zip(filter_sizes, params["conv_w"])):  # w:[fs,E,F]
        w_np = np.asarray(w, np.float32)
        for s in range(fs):
            w_all[s, :, i * F:(i + 1) * F] = w_np[s]
    w_all = jnp.asarray(w_all, jnp.bfloat16)

    # Additive bias + time-validity constant: bias where t < L_filter, -1e30
    # elsewhere (including padded columns).
    NEG = np.float32(-1e30)
    mb = np.full((seq_len, n_pad), NEG, np.float32)
    for i, fs in enumerate(filter_sizes):
        L = seq_len - fs + 1
        mb[:L, i * F:(i + 1) * F] = np.asarray(params["conv_b"][i], np.float32)
    mb = jnp.asarray(mb)

    # fc weights/bias, lane-padded; fc runs in bf16 (f32 accumulation).
    wfc = np.zeros((n_pad, out_pad), np.float32)
    wfc[:tot_cols, :output_dim] = np.asarray(params["fc_w"], np.float32)
    wfc = jnp.asarray(wfc, jnp.bfloat16)
    bfc_np = np.zeros((1, out_pad), np.float32)
    bfc_np[:, :output_dim] = np.asarray(params["fc_b"], np.float32)
    bfc = jnp.asarray(bfc_np)

    # Shift-realigned token ids: ids[(b*S + t), s] = token(b, t+s) (clamped;
    # out-of-range rows are killed by the -1e30 validity rows of mb).
    x_bs = x_tokens.T.astype(jnp.int32)                    # [batch, S]
    if padded_batch != batch:
        x_bs = jnp.concatenate(
            [x_bs, jnp.zeros((padded_batch - batch, seq_len), jnp.int32)], axis=0)
    t_idx = jnp.arange(seq_len)
    ids = jnp.stack(
        [x_bs[:, jnp.minimum(t_idx + s, seq_len - 1)] for s in range(max_fs)],
        axis=-1).reshape(padded_batch * seq_len, max_fs)

    kernel = make_cnn2_kernel(b_tile, seq_len, vocab_pad, max_fs, n_pad)

    # TODO(synk): for small output_dim the [padded_batch, out_pad] f32 slab has
    # large write amplification; pack several batch rows' logits per 128-lane
    # row (and unpack in the wrapper) when batch is large.
    out = pl.pallas_call(
        kernel,
        out_shape=jax.ShapeDtypeStruct((padded_batch, out_pad), jnp.float32),
        grid=(padded_batch // b_tile,),
        in_specs=[
            pl.BlockSpec((BTS, max_fs), lambda b: (b, 0)),             # ids
            pl.BlockSpec((vocab_pad, emb_dim), lambda b: (0, 0)),      # table
            pl.BlockSpec((max_fs, emb_dim, n_pad), lambda b: (0, 0, 0)),  # conv w
            pl.BlockSpec((seq_len, n_pad), lambda b: (0, 0)),          # bias+mask
            pl.BlockSpec((n_pad, out_pad), lambda b: (0, 0)),          # fc w
            pl.BlockSpec((1, out_pad), lambda b: (0, 0)),              # fc b
        ],
        out_specs=pl.BlockSpec((b_tile, out_pad), lambda b: (b, 0)),
        compiler_params=pltpu.CompilerParams(
            dimension_semantics=("parallel",),
            vmem_limit_bytes=32 * 1024 * 1024),
    )(ids, table, w_all, mb, wfc, bfc)

    return out[:batch, :output_dim]


def cnn2_reference(x_tokens, params, filter_sizes):
    """Pure-JAX reference matching the PyTorch forward (eval-mode dropout).

    Mirrors the kernel's mixed precision (bf16 table/conv/fc operands, f32
    accumulation) so the comparison is tight.
    """
    emb16 = jnp.take(params["embedding"].astype(jnp.bfloat16),
                     x_tokens.T, axis=0)                       # [B, S, E] bf16
    B, S, _ = emb16.shape
    pooled = []
    for fs, w, b in zip(filter_sizes, params["conv_w"], params["conv_b"]):
        L = S - fs + 1
        Fdim = w.shape[-1]
        acc = jnp.zeros((B, L, Fdim), jnp.float32)
        for s in range(fs):
            acc = acc + jnp.einsum("ble,ef->blf",
                                   emb16[:, s:s + L, :],
                                   w[s].astype(jnp.bfloat16),
                                   preferred_element_type=jnp.float32)
        act = jax.nn.relu(acc + b[None].astype(jnp.float32))   # [B, L, F]
        pooled.append(jnp.max(act, axis=1))                    # [B, F]
    cat = jnp.concatenate(pooled, axis=1).astype(jnp.bfloat16)
    logits = jnp.dot(cat, params["fc_w"].astype(jnp.bfloat16),
                     preferred_element_type=jnp.float32) + params["fc_b"]
    return jax.nn.sigmoid(logits)


if __name__ == "__main__":
    vocab_size, emb_dim = 50, 32
    n_filters, filter_sizes, output_dim = 8, (2, 3, 4), 4
    seq_len, batch = 8, 2

    key = jax.random.PRNGKey(0)
    nfs = len(filter_sizes)
    keys = jax.random.split(key, 4 + 2 * nfs)
    params = {
        "embedding": 0.1 * jax.random.normal(keys[0], (vocab_size, emb_dim), jnp.float32),
        "conv_w": [0.1 * jax.random.normal(keys[1 + i], (fs, emb_dim, n_filters), jnp.float32)
                   for i, fs in enumerate(filter_sizes)],
        "conv_b": [0.1 * jax.random.normal(keys[1 + nfs + i], (1, n_filters), jnp.float32)
                   for i in range(nfs)],
        "fc_w": 0.1 * jax.random.normal(keys[-3], (nfs * n_filters, output_dim), jnp.float32),
        "fc_b": 0.1 * jax.random.normal(keys[-2], (1, output_dim), jnp.float32),
    }
    x = jax.random.randint(keys[-1], (seq_len, batch), 0, vocab_size, jnp.int32)

    out = jax.block_until_ready(cnn2_forward(x, params, filter_sizes=filter_sizes))

    ref = cnn2_reference(x, params, filter_sizes)
    assert out.shape == (batch, output_dim), out.shape
    assert jnp.allclose(out, ref, atol=1e-3, rtol=1e-3), (out, ref)
    print("KERNEL_OK")
</pallas_src>

<mosaic_0001>
module attributes {stable_mosaic.version = 11 : i64} {
  func.func @kernel(%arg0: i32, %arg1: memref<64x4xi32, #tpu.memory_space<vmem>>, %arg2: memref<128x32xbf16, #tpu.memory_space<vmem>>, %arg3: memref<4x32x128xbf16, #tpu.memory_space<vmem>>, %arg4: memref<8x128xf32, #tpu.memory_space<vmem>>, %arg5: memref<128x128xbf16, #tpu.memory_space<vmem>>, %arg6: memref<1x128xf32, #tpu.memory_space<vmem>>, %arg7: memref<8x128xf32, #tpu.memory_space<vmem>>) attributes {dimension_semantics = [#tpu.dimension_semantics<parallel>], iteration_bounds = array<i64: 1>, scalar_prefetch = 0 : i64, scratch_operands = 0 : i64, tpu.core_type = #tpu.core_type<tc>, window_params = [{transform_indices = @transform_0, window_bounds = array<i64: 64, 4>}, {pipeline_mode = #tpu.pipeline_mode<synchronous>, transform_indices = @transform_1, window_bounds = array<i64: 128, 32>}, {pipeline_mode = #tpu.pipeline_mode<synchronous>, transform_indices = @transform_2, window_bounds = array<i64: 4, 32, 128>}, {pipeline_mode = #tpu.pipeline_mode<synchronous>, transform_indices = @transform_3, window_bounds = array<i64: 8, 128>}, {pipeline_mode = #tpu.pipeline_mode<synchronous>, transform_indices = @transform_4, window_bounds = array<i64: 128, 128>}, {pipeline_mode = #tpu.pipeline_mode<synchronous>, transform_indices = @transform_5, window_bounds = array<i64: 1, 128>}, {transform_indices = @transform_6, window_bounds = array<i64: 8, 128>}]} {
    %0 = tpu.iota {dimensions = array<i32: 1>} : vector<64x128xi32>
    %c0 = arith.constant 0 : index
    %c0_0 = arith.constant 0 : index
    %1 = vector.load %arg2[%c0, %c0_0] : memref<128x32xbf16, #tpu.memory_space<vmem>>, vector<128x32xbf16>
    %c0_1 = arith.constant 0 : index
    %c0_2 = arith.constant 0 : index
    %2 = vector.load %arg1[%c0_1, %c0_2] : memref<64x4xi32, #tpu.memory_space<vmem>>, vector<64x1xi32>
    %3 = vector.broadcast %2 : vector<64x1xi32> to vector<64x128xi32>
    %4 = arith.cmpi eq, %0, %3 : vector<64x128xi32>
    %cst = arith.constant 1.000000e+00 : f32
    %cst_3 = arith.constant 0.000000e+00 : f32
    %5 = vector.broadcast %cst : f32 to vector<64x128xf32>
    %6 = vector.broadcast %cst_3 : f32 to vector<64x128xf32>
    %7 = arith.select %4, %5, %6 : vector<64x128xi1>, vector<64x128xf32>
    %8 = arith.truncf %7 : vector<64x128xf32> to vector<64x128xbf16>
    %cst_4 = arith.constant dense<0.000000e+00> : vector<64x32xf32>
    %9 = tpu.matmul %8, %1, %cst_4 {dimension_numbers = #tpu.dot_dimension_numbers<[1], [0], [0], [1], [0, 0, 1, 1], [], []>} : vector<64x128xbf16>, vector<128x32xbf16>, vector<64x32xf32> -> vector<64x32xf32>
    %10 = arith.truncf %9 : vector<64x32xf32> to vector<64x32xbf16>
    %c0_5 = arith.constant 0 : index
    %c0_6 = arith.constant 0 : index
    %c0_7 = arith.constant 0 : index
    %11 = vector.load %arg3[%c0_5, %c0_6, %c0_7] : memref<4x32x128xbf16, #tpu.memory_space<vmem>>, vector<1x32x128xbf16>
    %12 = vector.shape_cast %11 : vector<1x32x128xbf16> to vector<32x128xbf16>
    %cst_8 = arith.constant dense<0.000000e+00> : vector<64x128xf32>
    %13 = tpu.matmul %10, %12, %cst_8 {dimension_numbers = #tpu.dot_dimension_numbers<[1], [0], [0], [1], [0, 0, 1, 1], [], []>} : vector<64x32xbf16>, vector<32x128xbf16>, vector<64x128xf32> -> vector<64x128xf32>
    %c0_9 = arith.constant 0 : index
    %c1 = arith.constant 1 : index
    %14 = vector.load %arg1[%c0_9, %c1] : memref<64x4xi32, #tpu.memory_space<vmem>>, vector<64x1xi32>
    %15 = vector.broadcast %14 : vector<64x1xi32> to vector<64x128xi32>
    %16 = arith.cmpi eq, %0, %15 : vector<64x128xi32>
    %cst_10 = arith.constant 1.000000e+00 : f32
    %cst_11 = arith.constant 0.000000e+00 : f32
    %17 = vector.broadcast %cst_10 : f32 to vector<64x128xf32>
    %18 = vector.broadcast %cst_11 : f32 to vector<64x128xf32>
    %19 = arith.select %16, %17, %18 : vector<64x128xi1>, vector<64x128xf32>
    %20 = arith.truncf %19 : vector<64x128xf32> to vector<64x128xbf16>
    %cst_12 = arith.constant dense<0.000000e+00> : vector<64x32xf32>
    %21 = tpu.matmul %20, %1, %cst_12 {dimension_numbers = #tpu.dot_dimension_numbers<[1], [0], [0], [1], [0, 0, 1, 1], [], []>} : vector<64x128xbf16>, vector<128x32xbf16>, vector<64x32xf32> -> vector<64x32xf32>
    %22 = arith.truncf %21 : vector<64x32xf32> to vector<64x32xbf16>
    %c1_13 = arith.constant 1 : index
    %c0_14 = arith.constant 0 : index
    %c0_15 = arith.constant 0 : index
    %23 = vector.load %arg3[%c1_13, %c0_14, %c0_15] : memref<4x32x128xbf16, #tpu.memory_space<vmem>>, vector<1x32x128xbf16>
    %24 = vector.shape_cast %23 : vector<1x32x128xbf16> to vector<32x128xbf16>
    %cst_16 = arith.constant dense<0.000000e+00> : vector<64x128xf32>
    %25 = tpu.matmul %22, %24, %cst_16 {dimension_numbers = #tpu.dot_dimension_numbers<[1], [0], [0], [1], [0, 0, 1, 1], [], []>} : vector<64x32xbf16>, vector<32x128xbf16>, vector<64x128xf32> -> vector<64x128xf32>
    %26 = arith.addf %13, %25 : vector<64x128xf32>
    %c0_17 = arith.constant 0 : index
    %c2 = arith.constant 2 : index
    %27 = vector.load %arg1[%c0_17, %c2] : memref<64x4xi32, #tpu.memory_space<vmem>>, vector<64x1xi32>
    %28 = vector.broadcast %27 : vector<64x1xi32> to vector<64x128xi32>
    %29 = arith.cmpi eq, %0, %28 : vector<64x128xi32>
    %cst_18 = arith.constant 1.000000e+00 : f32
    %cst_19 = arith.constant 0.000000e+00 : f32
    %30 = vector.broadcast %cst_18 : f32 to vector<64x128xf32>
    %31 = vector.broadcast %cst_19 : f32 to vector<64x128xf32>
    %32 = arith.select %29, %30, %31 : vector<64x128xi1>, vector<64x128xf32>
    %33 = arith.truncf %32 : vector<64x128xf32> to vector<64x128xbf16>
    %cst_20 = arith.constant dense<0.000000e+00> : vector<64x32xf32>
    %34 = tpu.matmul %33, %1, %cst_20 {dimension_numbers = #tpu.dot_dimension_numbers<[1], [0], [0], [1], [0, 0, 1, 1], [], []>} : vector<64x128xbf16>, vector<128x32xbf16>, vector<64x32xf32> -> vector<64x32xf32>
    %35 = arith.truncf %34 : vector<64x32xf32> to vector<64x32xbf16>
    %c2_21 = arith.constant 2 : index
    %c0_22 = arith.constant 0 : index
    %c0_23 = arith.constant 0 : index
    %36 = vector.load %arg3[%c2_21, %c0_22, %c0_23] : memref<4x32x128xbf16, #tpu.memory_space<vmem>>, vector<1x32x128xbf16>
    %37 = vector.shape_cast %36 : vector<1x32x128xbf16> to vector<32x128xbf16>
    %cst_24 = arith.constant dense<0.000000e+00> : vector<64x128xf32>
    %38 = tpu.matmul %35, %37, %cst_24 {dimension_numbers = #tpu.dot_dimension_numbers<[1], [0], [0], [1], [0, 0, 1, 1], [], []>} : vector<64x32xbf16>, vector<32x128xbf16>, vector<64x128xf32> -> vector<64x128xf32>
    %39 = arith.addf %26, %38 : vector<64x128xf32>
    %c0_25 = arith.constant 0 : index
    %c3 = arith.constant 3 : index
    %40 = vector.load %arg1[%c0_25, %c3] : memref<64x4xi32, #tpu.memory_space<vmem>>, vector<64x1xi32>
    %41 = vector.broadcast %40 : vector<64x1xi32> to vector<64x128xi32>
    %42 = arith.cmpi eq, %0, %41 : vector<64x128xi32>
    %cst_26 = arith.constant 1.000000e+00 : f32
    %cst_27 = arith.constant 0.000000e+00 : f32
    %43 = vector.broadcast %cst_26 : f32 to vector<64x128xf32>
    %44 = vector.broadcast %cst_27 : f32 to vector<64x128xf32>
    %45 = arith.select %42, %43, %44 : vector<64x128xi1>, vector<64x128xf32>
    %46 = arith.truncf %45 : vector<64x128xf32> to vector<64x128xbf16>
    %cst_28 = arith.constant dense<0.000000e+00> : vector<64x32xf32>
    %47 = tpu.matmul %46, %1, %cst_28 {dimension_numbers = #tpu.dot_dimension_numbers<[1], [0], [0], [1], [0, 0, 1, 1], [], []>} : vector<64x128xbf16>, vector<128x32xbf16>, vector<64x32xf32> -> vector<64x32xf32>
    %48 = arith.truncf %47 : vector<64x32xf32> to vector<64x32xbf16>
    %c3_29 = arith.constant 3 : index
    %c0_30 = arith.constant 0 : index
    %c0_31 = arith.constant 0 : index
    %49 = vector.load %arg3[%c3_29, %c0_30, %c0_31] : memref<4x32x128xbf16, #tpu.memory_space<vmem>>, vector<1x32x128xbf16>
    %50 = vector.shape_cast %49 : vector<1x32x128xbf16> to vector<32x128xbf16>
    %cst_32 = arith.constant dense<0.000000e+00> : vector<64x128xf32>
    %51 = tpu.matmul %48, %50, %cst_32 {dimension_numbers = #tpu.dot_dimension_numbers<[1], [0], [0], [1], [0, 0, 1, 1], [], []>} : vector<64x32xbf16>, vector<32x128xbf16>, vector<64x128xf32> -> vector<64x128xf32>
    %52 = arith.addf %39, %51 : vector<64x128xf32>
    %53 = vector.shape_cast %52 : vector<64x128xf32> to vector<8x8x128xf32>
    %c0_33 = arith.constant 0 : index
    %c0_34 = arith.constant 0 : index
    %54 = vector.load %arg4[%c0_33, %c0_34] : memref<8x128xf32, #tpu.memory_space<vmem>>, vector<8x128xf32>
    %55 = vector.shape_cast %54 : vector<8x128xf32> to vector<1x8x128xf32>
    %56 = vector.broadcast %55 : vector<1x8x128xf32> to vector<8x8x128xf32>
    %57 = arith.addf %53, %56 : vector<8x8x128xf32>
    %cst_35 = arith.constant 0.000000e+00 : f32
    %58 = vector.broadcast %cst_35 : f32 to vector<8x8x128xf32>
    %59 = arith.maximumf %57, %58 : vector<8x8x128xf32>
    %cst_36 = arith.constant dense<0xFF800000> : vector<8x128xf32>
    %60 = vector.multi_reduction <maximumf>, %59, %cst_36 [1] : vector<8x8x128xf32> to vector<8x128xf32>
    %61 = arith.truncf %60 : vector<8x128xf32> to vector<8x128xbf16>
    %c0_37 = arith.constant 0 : index
    %c0_38 = arith.constant 0 : index
    %62 = vector.load %arg5[%c0_37, %c0_38] : memref<128x128xbf16, #tpu.memory_space<vmem>>, vector<128x128xbf16>
    %cst_39 = arith.constant dense<0.000000e+00> : vector<8x128xf32>
    %63 = tpu.matmul %61, %62, %cst_39 {dimension_numbers = #tpu.dot_dimension_numbers<[1], [0], [0], [1], [0, 0, 1, 1], [], []>} : vector<8x128xbf16>, vector<128x128xbf16>, vector<8x128xf32> -> vector<8x128xf32>
    %c0_40 = arith.constant 0 : index
    %c0_41 = arith.constant 0 : index
    %64 = vector.load %arg6[%c0_40, %c0_41] : memref<1x128xf32, #tpu.memory_space<vmem>>, vector<1x128xf32>
    %65 = vector.broadcast %64 : vector<1x128xf32> to vector<8x128xf32>
    %66 = arith.addf %63, %65 : vector<8x128xf32>
    %67 = arith.negf %66 : vector<8x128xf32>
    %68 = math.exp %67 : vector<8x128xf32>
    %cst_42 = arith.constant 1.000000e+00 : f32
    %69 = vector.broadcast %cst_42 : f32 to vector<8x128xf32>
    %70 = arith.addf %69, %68 : vector<8x128xf32>
    %71 = arith.divf %69, %70 : vector<8x128xf32>
    %c0_43 = arith.constant 0 : index
    %c0_44 = arith.constant 0 : index
    %72 = vector.load %arg7[%c0_43, %c0_44] : memref<8x128xf32, #tpu.memory_space<vmem>>, vector<8x128xf32>
    tpu.vector_store %arg7[%c0_43, %c0_44], %71 {strides = array<i32>} : memref<8x128xf32, #tpu.memory_space<vmem>>, vector<8x128xf32>,
    return
  }
  func.func @transform_0(%arg0: i32) -> (i32, i32) {
    %c0_i32 = arith.constant 0 : i32
    %c0_i32_0 = arith.constant 0 : i32
    return %arg0, %c0_i32 : i32, i32
  }
  func.func @transform_1(%arg0: i32) -> (i32, i32) {
    %c0_i32 = arith.constant 0 : i32
    %c0_i32_0 = arith.constant 0 : i32
    %c0_i32_1 = arith.constant 0 : i32
    return %c0_i32, %c0_i32_0 : i32, i32
  }
  func.func @transform_2(%arg0: i32) -> (i32, i32, i32) {
    %c0_i32 = arith.constant 0 : i32
    %c0_i32_0 = arith.constant 0 : i32
    %c0_i32_1 = arith.constant 0 : i32
    %c0_i32_2 = arith.constant 0 : i32
    return %c0_i32, %c0_i32_0, %c0_i32_1 : i32, i32, i32
  }
  func.func @transform_3(%arg0: i32) -> (i32, i32) {
    %c0_i32 = arith.constant 0 : i32
    %c0_i32_0 = arith.constant 0 : i32
    %c0_i32_1 = arith.constant 0 : i32
    return %c0_i32, %c0_i32_0 : i32, i32
  }
  func.func @transform_4(%arg0: i32) -> (i32, i32) {
    %c0_i32 = arith.constant 0 : i32
    %c0_i32_0 = arith.constant 0 : i32
    %c0_i32_1 = arith.constant 0 : i32
    return %c0_i32, %c0_i32_0 : i32, i32
  }
  func.func @transform_5(%arg0: i32) -> (i32, i32) {
    %c0_i32 = arith.constant 0 : i32
    %c0_i32_0 = arith.constant 0 : i32
    %c0_i32_1 = arith.constant 0 : i32
    return %c0_i32, %c0_i32_0 : i32, i32
  }
  func.func @transform_6(%arg0: i32) -> (i32, i32) {
    %c0_i32 = arith.constant 0 : i32
    %c0_i32_0 = arith.constant 0 : i32
    return %arg0, %c0_i32 : i32, i32
  }
}

</mosaic_0001>

<bundles_post_ra>
// kernel: tpu_custom_call.1
= control target key start
LH: loop header
LB: loop body
LE: loop exit
PB: predicated region body
PF: predicated region fallthrough
CT: control target
= control target key end

     0   :  { %v1606_v2 = vmov 1   ;;  %v1607_v15 = vmov 0   ;;  %v1608_v16 = vmov 2   ;;  %s1993_s0 = inlined_call_operand.vmem [shape: s32[64,4], index: 0, kind: input, shape index: {}]   ;;  %s1994_s1 = inlined_call_operand.vmem [shape: bf16[128,32], index: 1, kind: input, shape index: {}]   ;;  %s1995_s2 = inlined_call_operand.vmem [shape: bf16[4,32,128], index: 2, kind: input, shape index: {}]   ;;  %s1996_s3 = inlined_call_operand.vmem [shape: f32[8,128], index: 3, kind: input, shape index: {}]   ;;  %s1997_s4 = inlined_call_operand.vmem [shape: bf16[128,128], index: 4, kind: input, shape index: {}]   ;;  %s1998_s5 = inlined_call_operand.vmem [shape: f32[1,128], index: 5, kind: input, shape index: {}]   ;;  %s1999_s6 = inlined_call_operand.hbm [shape: f32[8,128], index: 6, kind: output, shape index: {}]  }
   0x1   :  { %v1652_v0 = vld [vmem:[%s1993_s0 + $0x10] sm:$0xff]  ;;  %v1657_v1 = vld [vmem:[%s1993_s0] sm:$0xff]  ;;  %1544 = vset.pattern.permute.xlu1 %v1606_v2  ;;  %1543 = vset.pattern.permute.xlu0 %v1606_v2  ;;  %v1664_v3 = vld [vmem:[%s1993_s0 + $0x18] sm:$0xff] }
   0x2   :  { %223 = vperm.xlu1 %1544, %v1652_v0   ;;  %217 = vperm.xlu0 %1543, %v1657_v1   ;;  %v1669_v4 = vld [vmem:[%s1993_s0 + $0x8] sm:$0xff]  ;;  %v1674_v5 = vld [vmem:[%s1994_s1] sm:$0xff]   ;;  %v1701_v9 = vld [vmem:[%s1994_s1 + $0x10] sm:$0xff]  }
   0x3   :  { %v1679_v6 = vld [vmem:[%s1994_s1 + $0x8] sm:$0xff]   ;;  %1371 = vmatprep.subr.bf16.mxu1 %v1674_v5  ;;  %1347 = vmatprep.subr.bf16.mxu0 %v1674_v5  ;;  %v1693_v8 = vld [vmem:[%s1993_s0 + $0x20] sm:$0xff]  ;;  %v1707_v10 = vld [vmem:[%s1993_s0 + $0x38] sm:$0xff] }
   0x4   :  { %v1688_v7 = vld [vmem:[%s1993_s0 + $0x28] sm:$0xff]  ;;  %1372 = vmatpush3.bf16.msra.mxu1 %v1674_v5  ;;  %1348 = vmatpush3.bf16.msra.mxu0 %v1674_v5  ;;  %v1714_v11 = vld [vmem:[%s1993_s0 + $0x30] sm:$0xff]  ;;  %v1719_v12 = vld [vmem:[%s1994_s1 + $0x18] sm:$0xff]  }
   0x5   :  { %1373 = vmatprep.subr.bf16.mxu1 %v1679_v6  ;;  %1349 = vmatprep.subr.bf16.mxu0 %v1679_v6  ;;  %v1730_v13 = vld [vmem:[%s1994_s1 + $0x20] sm:$0xff]   ;;  %v1739_v14 = vld [vmem:[%s1994_s1 + $0x28] sm:$0xff]  }
   0x6   :  { %226 = vperm.xlu1 %1544, %v1664_v3   ;;  %220 = vperm.xlu0 %1543, %v1669_v4  }
   0x8   :  { %1374 = vmatpush3.bf16.msra.mxu1 %v1679_v6  ;;  %1350 = vmatpush3.bf16.msra.mxu0 %v1679_v6 }
   0x9   :  { %1375 = vmatprep.subr.bf16.mxu1 %v1701_v9  ;;  %1351 = vmatprep.subr.bf16.mxu0 %v1701_v9 }
   0xa   :  { %232 = vperm.xlu1 %1544, %v1688_v7   ;;  %229 = vperm.xlu0 %1543, %v1693_v8  }
   0xc   :  { %1376 = vmatpush3.bf16.msra.mxu1 %v1701_v9  ;;  %1352 = vmatpush3.bf16.msra.mxu0 %v1701_v9 }
   0xd   :  { %1377 = vmatprep.subr.bf16.mxu1 %v1719_v12  ;;  %1353 = vmatprep.subr.bf16.mxu0 %v1719_v12 }
   0xe   :  { %238 = vperm.xlu1 %1544, %v1707_v10   ;;  %235 = vperm.xlu0 %1543, %v1714_v11  }
  0x10   :  { %1378 = vmatpush3.bf16.msra.mxu1 %v1719_v12  ;;  %1354 = vmatpush3.bf16.msra.mxu0 %v1719_v12 }
  0x11   :  { %1379 = vmatprep.subr.bf16.mxu1 %v1730_v13  ;;  %1355 = vmatprep.subr.bf16.mxu0 %v1730_v13 }
  0x12   :  { %1545 = vset.pattern.permute.xlu1 %v1607_v15  ;;  %1547 = vset.pattern.permute.xlu0 %v1608_v16 }
  0x13   :  { %55 = vperm.xlu1 %1545, %v1669_v4   ;;  %517 = vperm.xlu0 %1547, %v1669_v4  }
  0x14   :  { %11 = vsyncpa [#allocation3], 0  ;;  %1380 = vmatpush3.bf16.msra.mxu1 %v1730_v13  ;;  %v1752_v17 = vld [vmem:[%s1994_s1 + $0x30] sm:$0xff]   ;;  %1356 = vmatpush3.bf16.msra.mxu0 %v1730_v13  ;;  %v1763_v18 = vld [vmem:[%s1994_s1 + $0x38] sm:$0xff]   ;;  %v1609_v20 = vmov 3   ;;  %v25_v21 = vlaneseq  ;;  %s1613_s10 = smov [#allocation2]  }
  0x15   :  { %1381 = vmatprep.subr.bf16.mxu1 %v1739_v14  ;;  %1357 = vmatprep.subr.bf16.mxu0 %v1739_v14  ;;  %v1562_v19 = vld [vmem:[%s1995_s2 + $0x10] sm:$0xff]   ;;  %v1563_v27 = vld [vmem:[%s1995_s2 + $0x18] sm:$0xff]   ;;  %v1610_v28 = vmov 1.0|1.0   ;;  %s1172_s11 = sshll.u32 %s1613_s10, 4  ;;  %s1173_s11 = int_to_ptr.vmem [resolvable:$true] %s1172_s11 }
  0x16   :  { %v1796_v24 = vand.u32 127, %v25_v21  ;;  %s1582_s12 = scalar_lea.vmem %s1173_s11, 128  ;;  %p1587_p1 = scmp.lt.s32.totalorder %s1173_s11, %s1173_s11 }
  0x17   :  { %58 = vperm.xlu1 %1545, %v1652_v0   ;;  %1548 = vset.pattern.permute.xlu0 %v1607_v15  ;;  %p1583_p0 = scmp.ne.s32.totalorder %s1173_s11, %s1582_s12  ;;  %p1588_p2 = scmp.lt.s32.totalorder %s1582_s12, %s1582_s12 }
  0x18   :  { %1382 = vmatpush3.bf16.msra.mxu1 %v1739_v14  ;;  %52 = vperm.xlu0 %1548, %v1657_v1  }
  0x19   :  { %1383 = vmatprep.subr.bf16.mxu1 %v1752_v17  ;;  %1358 = vmatpush3.bf16.msra.mxu0 %v1739_v14  ;;  %p1589_p3 = por %p1588_p2, %p1587_p1 }
  0x1a   :  { %1359 = vmatprep.subr.bf16.mxu0 %v1752_v17 }
  0x1b   :  { %1546 = vset.pattern.permute.xlu1 %v1608_v16  ;;  %p1590_p4 = pnand %p1589_p3, %p1583_p0 }
  0x1c   :  { %514 = vperm.xlu1 %1546, %v1657_v1   ;;  %1384 = vmatpush3.bf16.msra.mxu1 %v1752_v17 }
  0x1d   :  { %61 = vperm.xlu0 %1548, %v1664_v3   ;;  %1385 = vmatprep.subr.bf16.mxu1 %v1763_v18 }
  0x1e   :  { %1360 = vmatpush3.bf16.msra.mxu0 %v1752_v17 }
  0x1f   :  { %1361 = vmatprep.subr.bf16.mxu0 %v1763_v18 }
  0x20   :  { %520 = vperm.xlu1 %1546, %v1652_v0   ;;  %1386 = vmatpush3.bf16.msra.mxu1 %v1763_v18 }
  0x21   :  { %64 = vperm.xlu0 %1548, %v1693_v8   ;;  %1395 = vmatprep.subr.bf16.mxu1 %v1562_v19 }
  0x22   :  { %1362 = vmatpush3.bf16.msra.mxu0 %v1763_v18 }
  0x24   :  { %523 = vperm.xlu1 %1546, %v1664_v3  }
  0x25   :  { %73 = vperm.xlu0 %1548, %v1707_v10  }
  0x28   :  { %1549 = vset.pattern.permute.xlu1 %v1607_v15 }
  0x29   :  { %67 = vperm.xlu1 %1549, %v1688_v7   ;;  %1551 = vset.pattern.permute.xlu0 %v1608_v16 }
  0x2a   :  { %529 = vperm.xlu0 %1551, %v1688_v7  }
  0x2d   :  { %70 = vperm.xlu1 %1549, %v1714_v11  }
  0x2e   :  { %1552 = vset.pattern.permute.xlu0 %v1609_v20 }
  0x2f   :  { %729 = vperm.xlu0 %1552, %v1657_v1  }
  0x31   :  { %1550 = vset.pattern.permute.xlu1 %v1608_v16 }
  0x32   :  { %526 = vperm.xlu1 %1550, %v1693_v8  }
  0x33   :  { %738 = vperm.xlu0 %1552, %v1664_v3  }
  0x36   :  { %532 = vperm.xlu1 %1550, %v1714_v11  }
  0x37   :  { %744 = vperm.xlu0 %1552, %v1688_v7   ;;  %v1564_v7 = vld [vmem:[%s1995_s2] sm:$0xff]  }
  0x38   :  { %1407 = vmatprep.subr.bf16.mxu0 %v1564_v7 }
  0x3a   :  { %535 = vperm.xlu1 %1550, %v1707_v10  }
  0x3b   :  { %750 = vperm.xlu0 %1552, %v1707_v10   ;;  %v1565_v10 = vld [vmem:[%s1995_s2 + $0x8] sm:$0xff]  }
  0x3e   :  { %1553 = vset.pattern.permute.xlu1 %v1609_v20 }
  0x3f   :  { %732 = vperm.xlu1 %1553, %v1669_v4  }
  0x43   :  { %735 = vperm.xlu1 %1553, %v1652_v0  }
  0x47   :  { %741 = vperm.xlu1 %1553, %v1693_v8  }
  0x4b   :  { %747 = vperm.xlu1 %1553, %v1714_v11   ;;  %v1566_v11 = vld [vmem:[%s1995_s2 + $0x20] sm:$0xff]  }
  0x81   :  { %v224_v22 = vpop.permute.xlu1 %223  ;;  %v218_v23 = vpop.permute.xlu0 %217 }
  0x82   :  { %vm242_vm0 = vcmp.eq.s32.totalorder %v1796_v24, %v224_v22  ;;  %vm240_vm3 = vcmp.eq.s32.totalorder %v1796_v24, %v218_v23  ;;  %v1567_v22 = vld [vmem:[%s1995_s2 + $0x28] sm:$0xff]   ;;  %v1568_v23 = vld [vmem:[%s1995_s2 + $0x30] sm:$0xff]  }
  0x85   :  { %v227_v25 = vpop.permute.xlu1 %226  ;;  %v221_v26 = vpop.permute.xlu0 %220 }
  0x86   :  { %vm243_vm1 = vcmp.eq.s32.totalorder %v1796_v24, %v227_v25  ;;  %vm241_vm2 = vcmp.eq.s32.totalorder %v1796_v24, %v221_v26 }
  0x87   :  { %vm1198_vm4 = vmpackc.low %vm243_vm1, %vm242_vm0 }
  0x88   :  { %vm1196_vm5 = vmpackc.low %vm241_vm2, %vm240_vm3 }
  0x89   :  { %1387 = vmatprep.mubr.msk.bf16.mxu1 %vm1196_vm5, %v1610_v28  ;;  %v233_v29 = vpop.permute.xlu1 %232  ;;  %v230_v30 = vpop.permute.xlu0 %229 }
  0x8a   :  { %vm245_vm6 = vcmp.eq.s32.totalorder %v1796_v24, %v233_v29  ;;  %vm244_vm7 = vcmp.eq.s32.totalorder %v1796_v24, %v230_v30  ;;  %1388 = vmatmul.mubr.msk.bf16.vlgmr.msra.gmra.mrb[0].mxu1 %vm1198_vm4, %v1610_v28 }
  0x8b   :  { %vm1200_vm8 = vmpackc.low %vm245_vm6, %vm244_vm7  ;;  %1396 = vmatpush3.bf16.msra.mxu1 %v1562_v19 }
  0x8c   :  { %1391 = vmatprep.mubr.msk.bf16.mxu1 %vm1200_vm8, %v1610_v28  ;;  %1397 = vmatprep.subr.bf16.mxu1 %v1563_v27 }
  0x8d   :  { %v239_v31 = vpop.permute.xlu1 %238  ;;  %v236_v32 = vpop.permute.xlu0 %235 }
  0x8e   :  { %vm247_vm9 = vcmp.eq.s32.totalorder %v1796_v24, %v239_v31  ;;  %vm246_vm10 = vcmp.eq.s32.totalorder %v1796_v24, %v236_v32 }
  0x8f   :  { %vm1202_vm11 = vmpackc.low %vm247_vm9, %vm246_vm10  ;;  %1398 = vmatpush3.bf16.msra.mxu1 %v1563_v27 }
  0x90   :  { %1419 = vmatprep.subr.bf16.mxu1 %v1674_v5 }
  0x92   :  { %1392 = vmatmul.mubr.msk.bf16.gmra.mrb[4].mxu1 %vm1202_vm11, %v1610_v28  ;;  %v56_v33 = vpop.permute.xlu1 %55  ;;  %v518_v34 = vpop.permute.xlu0 %517 }
  0x93   :  { %vm538_vm12 = vcmp.eq.s32.totalorder %v1796_v24, %v518_v34  ;;  %vm76_vm14 = vcmp.eq.s32.totalorder %v1796_v24, %v56_v33 }
  0x96   :  { %v59_v35 = vpop.permute.xlu1 %58 }
  0x97   :  { %v53_v36 = vpop.permute.xlu0 %52  ;;  %vm77_vm13 = vcmp.eq.s32.totalorder %v1796_v24, %v59_v35 }
  0x98   :  { %vm75_vm15 = vcmp.eq.s32.totalorder %v1796_v24, %v53_v36 }
  0x99   :  { %vm1188_vm4 = vmpackc.low %vm76_vm14, %vm75_vm15  ;;  %vm346_vm14 = vcmask 261120  }
  0x9a   :  { %1363 = vmatprep.mubr.msk.bf16.mxu0 %vm1188_vm4, %v1610_v28 }
  0x9b   :  { %v515_v37 = vpop.permute.xlu1 %514 }
  0x9c   :  { %vm537_vm0 = vcmp.eq.s32.totalorder %v1796_v24, %v515_v37  ;;  %v62_v38 = vpop.permute.xlu0 %61 }
  0x9d   :  { %vm1819_vm1 = vmpackc.low %vm538_vm12, %vm537_vm0  ;;  %vm78_vm2 = vcmp.eq.s32.totalorder %v1796_v24, %v62_v38  ;;  %v1569_v38 = vld [vmem:[%s1995_s2 + $0x38] sm:$0xff]  }
  0x9e   :  { %vm1190_vm3 = vmpackc.low %vm78_vm2, %vm77_vm13 }
  0x9f   :  { %v521_v40 = vpop.permute.xlu1 %520  ;;  %1364 = vmatmul.mubr.msk.bf16.vlgmr.msra.gmra.mrb[0].mxu0 %vm1190_vm3, %v1610_v28 }
  0xa0   :  { %vm539_vm5 = vcmp.eq.s32.totalorder %v1796_v24, %v521_v40  ;;  %v65_v43 = vpop.permute.xlu0 %64  ;;  %1408 = vmatpush3.bf16.msra.mxu0 %v1564_v7 }
  0xa1   :  { %vm79_vm8 = vcmp.eq.s32.totalorder %v1796_v24, %v65_v43  ;;  %1409 = vmatprep.subr.bf16.mxu0 %v1565_v10 }
  0xa3   :  { %v524_v41 = vpop.permute.xlu1 %523 }
  0xa4   :  { %vm540_vm6 = vcmp.eq.s32.totalorder %v1796_v24, %v524_v41  ;;  %v74_v45 = vpop.permute.xlu0 %73  ;;  %1410 = vmatpush3.bf16.msra.mxu0 %v1565_v10 }
  0xa5   :  { %vm1828_vm7 = vmpackc.low %vm540_vm6, %vm539_vm5  ;;  %vm82_vm11 = vcmp.eq.s32.totalorder %v1796_v24, %v74_v45  ;;  %1443 = vmatprep.subr.bf16.mxu0 %v1566_v11 }
  0xa8   :  { %v68_v44 = vpop.permute.xlu1 %67 }
  0xa9   :  { %vm80_vm9 = vcmp.eq.s32.totalorder %v1796_v24, %v68_v44  ;;  %v530_v61 = vpop.permute.xlu0 %529 }
  0xaa   :  { %vm1192_vm10 = vmpackc.low %vm80_vm9, %vm79_vm8  ;;  %vm542_vm0 = vcmp.eq.s32.totalorder %v1796_v24, %v530_v61  ;;  %v1573_v61 = vld [vmem:[%s1997_s4 + $0x18] sm:$0xff]  }
  0xab   :  { %1367 = vmatprep.mubr.msk.bf16.mxu0 %vm1192_vm10, %v1610_v28 }
  0xac   :  { %v71_v46 = vpop.permute.xlu1 %70 }
  0xad   :  { %vm81_vm12 = vcmp.eq.s32.totalorder %v1796_v24, %v71_v46 }
  0xae   :  { %vm1194_vm13 = vmpackc.low %vm82_vm11, %vm81_vm12  ;;  %v730_v0 = vpop.permute.xlu0 %729 }
  0xaf   :  { %1368 = vmatmul.mubr.msk.bf16.gmra.mrb[4].mxu0 %vm1194_vm13, %v1610_v28  ;;  %vm752_vm5 = vcmp.eq.s32.totalorder %v1796_v24, %v730_v0  ;;  %v1576_v0 = vld [vmem:[%s1997_s4 + $0x30] sm:$0xff]  }
  0xb1   :  { %v527_v59 = vpop.permute.xlu1 %526 }
  0xb2   :  { %vm541_vm15 = vcmp.eq.s32.totalorder %v1796_v24, %v527_v59  ;;  %v739_v2 = vpop.permute.xlu0 %738  ;;  %v1571_v59 = vld [vmem:[%s1997_s4 + $0x8] sm:$0xff]  }
  0xb3   :  { %vm755_vm9 = vcmp.eq.s32.totalorder %v1796_v24, %v739_v2 }
  0xb5   :  { %v533_v60 = vpop.permute.xlu1 %532 }
  0xb6   :  { %vm543_vm2 = vcmp.eq.s32.totalorder %v1796_v24, %v533_v60  ;;  %v745_v4 = vpop.permute.xlu0 %744  ;;  %v1572_v60 = vld [vmem:[%s1997_s4 + $0x10] sm:$0xff]  }
  0xb7   :  { %vm757_vm11 = vcmp.eq.s32.totalorder %v1796_v24, %v745_v4 }
  0xb9   :  { %v536_v62 = vpop.permute.xlu1 %535 }
  0xba   :  { %vm544_vm3 = vcmp.eq.s32.totalorder %v1796_v24, %v536_v62  ;;  %v1574_v62 = vld [vmem:[%s1997_s4 + $0x20] sm:$0xff]  }
  0xbb   :  { %vm1226_vm6 = vmpackc.low %vm544_vm3, %vm543_vm2  ;;  %vm1055_vm2 = vcmask 1041409   ;;  %vm1057_vm3 = vcmask 1042434  }
  0xbe   :  { %v733_v63 = vpop.permute.xlu1 %732 }
  0xbf   :  { %vm753_vm4 = vcmp.eq.s32.totalorder %v1796_v24, %v733_v63  ;;  %v1575_v63 = vld [vmem:[%s1997_s4 + $0x28] sm:$0xff]  }
  0xc2   :  { %v736_v1 = vpop.permute.xlu1 %735 }
  0xc3   :  { %vm754_vm8 = vcmp.eq.s32.totalorder %v1796_v24, %v736_v1  ;;  %v1577_v1 = vld [vmem:[%s1997_s4 + $0x38] sm:$0xff]  }
  0xc4   :  { %vm1240_vm12 = vmpackc.low %vm755_vm9, %vm754_vm8  ;;  %vm1067_vm8 = vcmask 1047559  }
  0xc6   :  { %v742_v3 = vpop.permute.xlu1 %741 }
  0xc7   :  { %vm756_vm10 = vcmp.eq.s32.totalorder %v1796_v24, %v742_v3  ;;  %v943_v3 = vld [vmem:[%s1996_s3] sm:$0xff] }
  0xc8   :  { %vm1242_vm13 = vmpackc.low %vm757_vm11, %vm756_vm10 }
 0x15d   :  { %v1389_v47 = vpop.f32.mrb[0].mxu1 }
 0x15e   :  { %v294_v48 = vpop.f32.mrb[1].mxu1 }
 0x15f   :  { %v1390_v49 = vpop.f32.mrb[2].mxu1 }
 0x160   :  { %v326_v50 = vpack.c.bf16 %v1390_v49, %v1389_v47  ;;  %v297_v51 = vpop.f32.mrb[3].mxu1 }
 0x161   :  { %v325_v52 = vpack.c.bf16 %v297_v51, %v294_v48 }
 0x163   :  { %1399 = vmatprep.mubr.msk.bf16.mxu1 %vm346_vm14, %v325_v52 }
 0x164   :  { %1400 = vmatmul.mubr.msk.bf16.vlgmr.msra.gmra.mrb[8].mxu1 %vm346_vm14, %v326_v50 }
 0x165   :  { %1420 = vmatpush3.bf16.msra.mxu1 %v1674_v5  ;;  %v1393_v53 = vpop.f32.mrb[4].mxu1 }
 0x166   :  { %v310_v54 = vpop.f32.mrb[5].mxu1  ;;  %1421 = vmatprep.subr.bf16.mxu1 %v1679_v6 }
 0x167   :  { %v1394_v55 = vpop.f32.mrb[6].mxu1 }
 0x168   :  { %v328_v56 = vpack.c.bf16 %v1394_v55, %v1393_v53  ;;  %v313_v57 = vpop.f32.mrb[7].mxu1 }
 0x169   :  { %v327_v58 = vpack.c.bf16 %v313_v57, %v310_v54  ;;  %1422 = vmatpush3.bf16.msra.mxu1 %v1679_v6  ;;  %v1570_v57 = vld [vmem:[%s1997_s4] sm:$0xff]  }
 0x16a   :  { %1423 = vmatprep.subr.bf16.mxu1 %v1701_v9 }
 0x16b   :  { %1403 = vmatprep.mubr.msk.bf16.mxu1 %vm346_vm14, %v327_v58  ;;  %v1611_v58 = vmov 0.0  }
 0x16c   :  { %1404 = vmatmul.mubr.msk.bf16.gmra.mrb[12].mxu1 %vm346_vm14, %v328_v56 }
 0x16d   :  { %1424 = vmatpush3.bf16.msra.mxu1 %v1701_v9  ;;  %1435 = vmatprep.mubr.msk.bf16.mxu1 %vm1819_vm1, %v1610_v28  ;;  %vm1224_vm1 = vmpackc.low %vm542_vm0, %vm541_vm15 }
 0x16e   :  { %1425 = vmatprep.subr.bf16.mxu1 %v1719_v12 }
 0x171   :  { %1426 = vmatpush3.bf16.msra.mxu1 %v1719_v12 }
 0x172   :  { %1427 = vmatprep.subr.bf16.mxu1 %v1730_v13  ;;  %v1365_v8 = vpop.f32.mrb[0].mxu0 }
 0x175   :  { %1428 = vmatpush3.bf16.msra.mxu1 %v1730_v13 }
 0x176   :  { %1429 = vmatprep.subr.bf16.mxu1 %v1739_v14 }
 0x179   :  { %1430 = vmatpush3.bf16.msra.mxu1 %v1739_v14 }
 0x17a   :  { %1431 = vmatprep.subr.bf16.mxu1 %v1752_v17 }
 0x17d   :  { %1432 = vmatpush3.bf16.msra.mxu1 %v1752_v17 }
 0x17e   :  { %1433 = vmatprep.subr.bf16.mxu1 %v1763_v18 }
 0x181   :  { %1434 = vmatpush3.bf16.msra.mxu1 %v1763_v18 }
 0x182   :  { %1455 = vmatprep.subr.bf16.mxu1 %v1674_v5 }
 0x184   :  { %1436 = vmatmul.mubr.msk.bf16.vlgmr.msra.gmra.mrb[16].mxu1 %vm1828_vm7, %v1610_v28  ;;  %vm1238_vm7 = vmpackc.low %vm753_vm4, %vm752_vm5  ;;  %vm1059_vm4 = vcmask 1043459   ;;  %vm1061_vm5 = vcmask 1044484  }
 0x185   :  { %1456 = vmatpush3.bf16.msra.mxu1 %v1674_v5  ;;  %1439 = vmatprep.mubr.msk.bf16.mxu1 %vm1224_vm1, %v1610_v28  ;;  %v748_v5 = vpop.permute.xlu1 %747 }
 0x186   :  { %1457 = vmatprep.subr.bf16.mxu1 %v1679_v6  ;;  %vm758_vm15 = vcmp.eq.s32.totalorder %v1796_v24, %v748_v5 }
 0x189   :  { %1458 = vmatpush3.bf16.msra.mxu1 %v1679_v6  ;;  %v751_v6 = vpop.permute.xlu0 %750 }
 0x18a   :  { %1459 = vmatprep.subr.bf16.mxu1 %v1701_v9  ;;  %vm759_vm0 = vcmp.eq.s32.totalorder %v1796_v24, %v751_v6 }
 0x18b   :  { %vm1244_vm1 = vmpackc.low %vm759_vm0, %vm758_vm15 }
 0x18c   :  { %1440 = vmatmul.mubr.msk.bf16.gmra.mrb[20].mxu1 %vm1226_vm6, %v1610_v28  ;;  %vm1063_vm6 = vcmask 1045509  }
 0x18d   :  { %1460 = vmatpush3.bf16.msra.mxu1 %v1701_v9  ;;  %1471 = vmatprep.mubr.msk.bf16.mxu1 %vm1238_vm7, %v1610_v28  ;;  %v177_v9 = vpop.f32.mrb[1].mxu0  ;;  %vm1065_vm7 = vcmask 1046534  }
 0x18e   :  { %1461 = vmatprep.subr.bf16.mxu1 %v1719_v12 }
 0x191   :  { %1462 = vmatpush3.bf16.msra.mxu1 %v1719_v12  ;;  %v1366_v12 = vpop.f32.mrb[2].mxu0 }
 0x192   :  { %1463 = vmatprep.subr.bf16.mxu1 %v1730_v13 }
 0x195   :  { %1464 = vmatpush3.bf16.msra.mxu1 %v1730_v13  ;;  %v209_v13 = vpack.c.bf16 %v1366_v12, %v1365_v8 }
 0x196   :  { %1465 = vmatprep.subr.bf16.mxu1 %v1739_v14 }
 0x199   :  { %1466 = vmatpush3.bf16.msra.mxu1 %v1739_v14  ;;  %v180_v14 = vpop.f32.mrb[3].mxu0 }
 0x19a   :  { %1467 = vmatprep.subr.bf16.mxu1 %v1752_v17  ;;  %v208_v15 = vpack.c.bf16 %v180_v14, %v177_v9  ;;  %v1369_v16 = vpop.f32.mrb[4].mxu0 }
 0x19c   :  { %1411 = vmatprep.mubr.msk.bf16.mxu0 %vm346_vm14, %v208_v15 }
 0x19d   :  { %1468 = vmatpush3.bf16.msra.mxu1 %v1752_v17  ;;  %1412 = vmatmul.mubr.msk.bf16.vlgmr.msra.gmra.mrb[8].mxu0 %vm346_vm14, %v209_v13  ;;  %v193_v17 = vpop.f32.mrb[5].mxu0 }
 0x19e   :  { %1469 = vmatprep.subr.bf16.mxu1 %v1763_v18  ;;  %1444 = vmatpush3.bf16.msra.mxu0 %v1566_v11 }
 0x19f   :  { %1445 = vmatprep.subr.bf16.mxu0 %v1567_v22 }
 0x1a1   :  { %1470 = vmatpush3.bf16.msra.mxu1 %v1763_v18  ;;  %v1370_v18 = vpop.f32.mrb[6].mxu0 }
 0x1a2   :  { %v211_v19 = vpack.c.bf16 %v1370_v18, %v1369_v16  ;;  %v196_v20 = vpop.f32.mrb[7].mxu0  ;;  %1446 = vmatpush3.bf16.msra.mxu0 %v1567_v22 }
 0x1a3   :  { %v210_v21 = vpack.c.bf16 %v196_v20, %v193_v17  ;;  %1479 = vmatprep.subr.bf16.mxu0 %v1568_v23 }
 0x1a4   :  { %1472 = vmatmul.mubr.msk.bf16.vlgmr.msra.gmra.mrb[24].mxu1 %vm1240_vm12, %v1610_v28 }
 0x1a5   :  { %1475 = vmatprep.mubr.msk.bf16.mxu1 %vm1242_vm13, %v1610_v28  ;;  %1415 = vmatprep.mubr.msk.bf16.mxu0 %vm346_vm14, %v210_v21 }
 0x1a6   :  { %1416 = vmatmul.mubr.msk.bf16.gmra.mrb[12].mxu0 %vm346_vm14, %v211_v19 }
 0x1ac   :  { %1476 = vmatmul.mubr.msk.bf16.gmra.mrb[28].mxu1 %vm1244_vm1, %v1610_v28 }
 0x237   :  { %v1916_v24 = vpop.f32.mrb[8].mxu1 }
 0x238   :  { %v1918_v25 = vpop.f32.mrb[9].mxu1 }
 0x239   :  { %v1920_v26 = vpop.f32.mrb[10].mxu1 }
 0x23a   :  { %v1922_v27 = vpop.f32.mrb[11].mxu1 }
 0x23f   :  { %v1924_v28 = vpop.f32.mrb[12].mxu1 }
 0x240   :  { %v1926_v29 = vpop.f32.mrb[13].mxu1 }
 0x241   :  { %v1928_v30 = vpop.f32.mrb[14].mxu1 }
 0x242   :  { %v1930_v31 = vpop.f32.mrb[15].mxu1 }
 0x257   :  { %v1437_v32 = vpop.f32.mrb[16].mxu1 }
 0x258   :  { %v591_v33 = vpop.f32.mrb[17].mxu1 }
 0x259   :  { %v1438_v34 = vpop.f32.mrb[18].mxu1 }
 0x25a   :  { %v623_v35 = vpack.c.bf16 %v1438_v34, %v1437_v32  ;;  %v594_v36 = vpop.f32.mrb[19].mxu1 }
 0x25b   :  { %v622_v37 = vpack.c.bf16 %v594_v36, %v591_v33 }
 0x25d   :  { %1447 = vmatprep.mubr.msk.bf16.mxu0 %vm346_vm14, %v622_v37 }
 0x25e   :  { %1448 = vmatmul.mubr.msk.bf16.vlgmr.msra.gmra.mrb[8].mxu0 %vm346_vm14, %v623_v35 }
 0x25f   :  { %v1441_v39 = vpop.f32.mrb[20].mxu1  ;;  %1480 = vmatpush3.bf16.msra.mxu0 %v1568_v23 }
 0x260   :  { %v607_v40 = vpop.f32.mrb[21].mxu1  ;;  %1481 = vmatprep.subr.bf16.mxu0 %v1569_v38 }
 0x261   :  { %v1442_v41 = vpop.f32.mrb[22].mxu1 }
 0x262   :  { %v625_v42 = vpack.c.bf16 %v1442_v41, %v1441_v39  ;;  %v610_v43 = vpop.f32.mrb[23].mxu1 }
 0x263   :  { %v624_v44 = vpack.c.bf16 %v610_v43, %v607_v40  ;;  %1482 = vmatpush3.bf16.msra.mxu0 %v1569_v38 }
 0x264   :  { %1491 = vmatprep.subr.bf16.mxu0 %v1611_v58 }
 0x265   :  { %1451 = vmatprep.mubr.msk.bf16.mxu0 %vm346_vm14, %v624_v44 }
 0x266   :  { %1452 = vmatmul.mubr.msk.bf16.gmra.mrb[12].mxu0 %vm346_vm14, %v625_v42 }
 0x277   :  { %v1473_v45 = vpop.f32.mrb[24].mxu1 }
 0x278   :  { %v806_v46 = vpop.f32.mrb[25].mxu1 }
 0x279   :  { %v1474_v47 = vpop.f32.mrb[26].mxu1 }
 0x27a   :  { %v838_v48 = vpack.c.bf16 %v1474_v47, %v1473_v45  ;;  %v809_v49 = vpop.f32.mrb[27].mxu1 }
 0x27b   :  { %v837_v50 = vpack.c.bf16 %v809_v49, %v806_v46 }
 0x27d   :  { %1483 = vmatprep.mubr.msk.bf16.mxu0 %vm346_vm14, %v837_v50 }
 0x27e   :  { %1484 = vmatmul.mubr.msk.bf16.vlgmr.msra.gmra.mrb[8].mxu0 %vm346_vm14, %v838_v48 }
 0x27f   :  { %v1477_v51 = vpop.f32.mrb[28].mxu1  ;;  %1492 = vmatpush3.bf16.msra.mxu0 %v1570_v57 }
 0x280   :  { %v822_v52 = vpop.f32.mrb[29].mxu1  ;;  %1493 = vmatprep.subr.bf16.mxu0 %v1611_v58 }
 0x281   :  { %v1478_v53 = vpop.f32.mrb[30].mxu1 }
 0x282   :  { %v840_v54 = vpack.c.bf16 %v1478_v53, %v1477_v51  ;;  %v825_v55 = vpop.f32.mrb[31].mxu1 }
 0x283   :  { %v839_v56 = vpack.c.bf16 %v825_v55, %v822_v52  ;;  %1494 = vmatpush3.bf16.msra.mxu0 %v1571_v59 }
 0x284   :  { %1495 = vmatprep.subr.bf16.mxu0 %v1611_v58 }
 0x285   :  { %1487 = vmatprep.mubr.msk.bf16.mxu0 %vm346_vm14, %v839_v56 }
 0x286   :  { %1488 = vmatmul.mubr.msk.bf16.gmra.mrb[12].mxu0 %vm346_vm14, %v840_v54  ;;  %vm1612_vm14 = vmmov 0  }
 0x287   :  { %1496 = vmatpush3.bf16.msra.mxu0 %v1572_v60  ;;  %1507 = vmatprep.mubr.msk.bf16.mxu0 %vm1612_vm14, %v1611_v58 }
 0x288   :  { %1497 = vmatprep.subr.bf16.mxu0 %v1611_v58 }
 0x28b   :  { %1498 = vmatpush3.bf16.msra.mxu0 %v1573_v61 }
 0x28c   :  { %1499 = vmatprep.subr.bf16.mxu0 %v1611_v58 }
 0x28f   :  { %1500 = vmatpush3.bf16.msra.mxu0 %v1574_v62 }
 0x290   :  { %1501 = vmatprep.subr.bf16.mxu0 %v1611_v58 }
 0x293   :  { %1502 = vmatpush3.bf16.msra.mxu0 %v1575_v63 }
 0x294   :  { %1503 = vmatprep.subr.bf16.mxu0 %v1611_v58 }
 0x297   :  { %1504 = vmatpush3.bf16.msra.mxu0 %v1576_v0 }
 0x298   :  { %1505 = vmatprep.subr.bf16.mxu0 %v1611_v58 }
 0x29b   :  { %1506 = vmatpush3.bf16.msra.mxu0 %v1577_v1 }
 0x351   :  { %v1485_v2 = vpop.f32.mrb[8].mxu0 }
 0x352   :  { %v1511_v4 = vadd.f32 %v1485_v2, %v1916_v24  ;;  %v904_v5 = vpop.f32.mrb[9].mxu0 }
 0x353   :  { %v1512_v6 = vadd.f32 %v904_v5, %v1918_v25  ;;  %v1486_v7 = vpop.f32.mrb[10].mxu0 }
 0x354   :  { %v946_v8 = vadd.f32 %v1511_v4, %v943_v3  ;;  %v1513_v9 = vadd.f32 %v1486_v7, %v1920_v26  ;;  %v907_v10 = vpop.f32.mrb[11].mxu0 }
 0x355   :  { %v944_v11 = vadd.f32 %v1512_v6, %v943_v3  ;;  %v1514_v12 = vadd.f32 %v907_v10, %v1922_v27 }
 0x356   :  { %v954_v13 = vmax.f32 %v946_v8, 0.0  ;;  %v947_v14 = vadd.f32 %v1513_v9, %v943_v3 }
 0x357   :  { %v952_v15 = vmax.f32 %v944_v11, 0.0  ;;  %v945_v16 = vadd.f32 %v1514_v12, %v943_v3 }
 0x358   :  { %v972_v17 = vrot.slane %v954_v13, 4  ;;  %v955_v18 = vmax.f32 %v947_v14, 0.0 }
 0x359   :  { %v960_v19 = vrot.slane %v952_v15, 4  ;;  %v953_v20 = vmax.f32 %v945_v16, 0.0  ;;  %v1489_v21 = vpop.f32.mrb[12].mxu0 }
 0x35a   :  { %v973_v22 = vmax.f32 %v954_v13, %v972_v17  ;;  %v978_v23 = vrot.slane %v955_v18, 4  ;;  %v1515_v24 = vadd.f32 %v1489_v21, %v1924_v28  ;;  %v920_v25 = vpop.f32.mrb[13].mxu0 }
 0x35b   :  { %v961_v32 = vmax.f32 %v952_v15, %v960_v19  ;;  %v966_v26 = vrot.slane %v953_v20, 4  ;;  %v1516_v33 = vadd.f32 %v920_v25, %v1926_v29  ;;  %v1490_v34 = vpop.f32.mrb[14].mxu0 }
 0x35c   :  { %v974_v27 = vrot.slane %v973_v22, 2  ;;  %v979_v35 = vmax.f32 %v955_v18, %v978_v23  ;;  %v950_v36 = vadd.f32 %v1515_v24, %v943_v3  ;;  %v1517_v37 = vadd.f32 %v1490_v34, %v1928_v30  ;;  %v923_v38 = vpop.f32.mrb[15].mxu0 }
 0x35d   :  { %v962_v39 = vrot.slane %v961_v32, 2  ;;  %v967_v40 = vmax.f32 %v953_v20, %v966_v26  ;;  %v948_v41 = vadd.f32 %v1516_v33, %v943_v3  ;;  %v1518_v42 = vadd.f32 %v923_v38, %v1930_v31 }
 0x35e   :  { %v975_v43 = vmax.f32 %v973_v22, %v974_v27  ;;  %v980_v44 = vrot.slane %v979_v35, 2  ;;  %v958_v28 = vmax.f32 %v950_v36, 0.0  ;;  %v951_v45 = vadd.f32 %v1517_v37, %v943_v3 }
 0x35f   :  { %v963_v46 = vmax.f32 %v961_v32, %v962_v39  ;;  %v968_v47 = vrot.slane %v967_v40, 2  ;;  %v956_v48 = vmax.f32 %v948_v41, 0.0  ;;  %v949_v29 = vadd.f32 %v1518_v42, %v943_v3 }
 0x360   :  { %v976_v49 = vrot.slane %v975_v43, 1  ;;  %v981_v50 = vmax.f32 %v979_v35, %v980_v44  ;;  %v996_v51 = vrot.slane %v958_v28, 4  ;;  %v959_v52 = vmax.f32 %v951_v45, 0.0 }
 0x361   :  { %v964_v53 = vrot.slane %v963_v46, 1  ;;  %v969_v30 = vmax.f32 %v967_v40, %v968_v47  ;;  %v984_v54 = vrot.slane %v956_v48, 4  ;;  %v957_v55 = vmax.f32 %v949_v29, 0.0 }
 0x362   :  { %v977_v56 = vmax.f32 %v975_v43, %v976_v49  ;;  %v982_v57 = vrot.slane %v981_v50, 1  ;;  %v997_v58 = vmax.f32 %v958_v28, %v996_v51  ;;  %v1002_v31 = vrot.slane %v959_v52, 4 }
 0x363   :  { %v965_v59 = vmax.f32 %v963_v46, %v964_v53  ;;  %v970_v60 = vrot.slane %v969_v30, 1  ;;  %v985_v61 = vmax.f32 %v956_v48, %v984_v54  ;;  %v990_v62 = vrot.slane %v957_v55, 4  ;;  %v1256_v46 = vld [vmem:[%s1998_s5] ss:$0 sm:$0xff] }
 0x364   :  { %v983_v63 = vmax.f32 %v981_v50, %v982_v57  ;;  %v998_v0 = vrot.slane %v997_v58, 2  ;;  %v1003_v1 = vmax.f32 %v959_v52, %v1002_v31  ;;  %v1010_v6 = vpack.c.bf16 %v977_v56, %v977_v56 }
 0x365   :  { %v1008_v2 = vpack.c.bf16 %v965_v59, %v965_v59  ;;  %v971_v3 = vmax.f32 %v969_v30, %v970_v60  ;;  %v986_v4 = vrot.slane %v985_v61, 2  ;;  %v991_v5 = vmax.f32 %v957_v55, %v990_v62 }
 0x366   :  { %v999_v7 = vmax.f32 %v997_v58, %v998_v0  ;;  %v1004_v8 = vrot.slane %v1003_v1, 2  ;;  %v1011_v9 = vpack.c.bf16 %v983_v63, %v983_v63  ;;  %v1049_v19 = vunpack.c.l.b16 %v1010_v6 }
 0x367   :  { %v1009_v10 = vpack.c.bf16 %v971_v3, %v971_v3  ;;  %v987_v11 = vmax.f32 %v985_v61, %v986_v4  ;;  %v992_v12 = vrot.slane %v991_v5, 2  ;;  %v1047_v15 = vunpack.c.l.b16 %v1008_v2 }
 0x368   :  { %v1000_v13 = vrot.slane %v999_v7, 1  ;;  %v1005_v14 = vmax.f32 %v1003_v1, %v1004_v8  ;;  %v1050_v22 = vunpack.c.l.b16 %v1011_v9 }
 0x369   :  { %v1048_v16 = vunpack.c.l.b16 %v1009_v10  ;;  %v988_v17 = vrot.slane %v987_v11, 1  ;;  %v993_v18 = vmax.f32 %v991_v5, %v992_v12 }
 0x36a   :  { %v1001_v20 = vmax.f32 %v999_v7, %v1000_v13  ;;  %v1006_v21 = vrot.slane %v1005_v14, 1 }
 0x36b   :  { %v1056_v23 = vsel %vm1055_vm2, %v1048_v16, %v1047_v15  ;;  %v989_v24 = vmax.f32 %v987_v11, %v988_v17  ;;  %v994_v25 = vrot.slane %v993_v18, 1 }
 0x36c   :  { %v1058_v32 = vsel %vm1057_vm3, %v1049_v19, %v1056_v23  ;;  %v1007_v26 = vmax.f32 %v1005_v14, %v1006_v21  ;;  %v1014_v35 = vpack.c.bf16 %v1001_v20, %v1001_v20 }
 0x36d   :  { %v1012_v33 = vpack.c.bf16 %v989_v24, %v989_v24  ;;  %v1060_v34 = vsel %vm1059_vm4, %v1050_v22, %v1058_v32  ;;  %v995_v27 = vmax.f32 %v993_v18, %v994_v25 }
 0x36e   :  { %v1015_v37 = vpack.c.bf16 %v1007_v26, %v1007_v26  ;;  %v1053_v41 = vunpack.c.l.b16 %v1014_v35 }
 0x36f   :  { %v1051_v36 = vunpack.c.l.b16 %v1012_v33  ;;  %v1013_v38 = vpack.c.bf16 %v995_v27, %v995_v27 }
 0x370   :  { %v1054_v42 = vunpack.c.l.b16 %v1015_v37 }
 0x371   :  { %v1062_v39 = vsel %vm1061_vm5, %v1051_v36, %v1060_v34  ;;  %v1052_v40 = vunpack.c.l.b16 %v1013_v38 }
 0x373   :  { %v1064_v43 = vsel %vm1063_vm6, %v1052_v40, %v1062_v39 }
 0x374   :  { %v1066_v44 = vsel %vm1065_vm7, %v1053_v41, %v1064_v43 }
 0x375   :  { %v1068_v28 = vsel %vm1067_vm8, %v1054_v42, %v1066_v44 }
 0x376   :  { %v1069_v45 = vpack.c.b16 %v1068_v28, %v1068_v28 }
 0x378   :  { %1508 = vmatmul.mubr.bf16.vlgmr.msra.gmra.mrb[16].mxu0 %v1069_v45 }
 0x44b   :  { %v1153_v47 = vpop.f32.mrb[16].mxu0 }
 0x44c   :  { %v1154_v48 = vadd.f32 %v1256_v46, %v1153_v47  ;;  %v1509_v29 = vpop.f32.mrb[17].mxu0 }
 0x44d   :  { %v1156_v49 = vpop.f32.mrb[18].mxu0 }
 0x44e   :  { %v1265_v50 = vmul.f32 -1.442695, %v1154_v48  ;;  %v1510_v51 = vpop.f32.mrb[19].mxu0 }
 0x450   :  { %1578 = vpow2.f32 %v1265_v50 }
 0x45a   :  { %v1579_v52 = vpop.eup %1578 }
 0x45b   :  { %v1162_v53 = vadd.f32 1.0, %v1579_v52 }
 0x45d   :  { %1580 = vrcp.f32 %v1162_v53 }
 0x467   :  { %v1581_v30 = vpop.eup %1580 }
 0x468   :  { %1165 = vst [vmem:[#allocation2] sm:$0xff] %v1581_v30 }
 0x469   :  { %1593 = shalt.err (!%p1590_p4)
}
 0x46a   :  { %s1594_s14 = scalar_lea.hbm %s1999_s6, 128 }
 0x46b   :  { %p1595_p5 = scmp.ne.s32.totalorder %s1999_s6, %s1594_s14  ;;  %p1598_p6 = scmp.lt.u32.totalorder %s1594_s14, %s1999_s6 }
 0x46d   :  { %p1600_p7 = pnand %p1598_p6, %p1595_p5 }
 0x46f   :  { %1603 = shalt.err (!%p1600_p7)
}
 0x470   :  { %1175 = dma.vmem_to_hbm [thread:$0]  %s1173_s11, 128, %s1999_s6, [#allocation3]  }
 0x471   :  { %1604 = dma.done.wait [#allocation3], 128  }
 0x472   :  { %1605 = vsyncadd [#allocation3], 4294967168 }
 0x473   :  { %1179 = vsyncpa [#allocation3], 1 }

</bundles_post_ra>
